<compile_context>
chip_gen: v7x
topology: tpu7x:2x2x1
jax: 0.10.0
libtpu: 0.0.40
codegen_flags: <defaults>
</compile_context>

<pallas_src>
import functools
import math

import jax
import jax.numpy as jnp
from jax.experimental import pallas as pl
from jax.experimental.pallas import tpu as pltpu

_LOG2 = math.log(2.0)
_ROW_TILE_CAP = 1024   # rows per grid step; layer kernel ~2.5 KB/row in VMEM


def _round_up(x, m):
    return ((x + m - 1) // m) * m


def _choose_row_tile(m, cap=_ROW_TILE_CAP):
    """Row tile: multiple of 8, <= cap, and (when possible) >=2 grid steps so
    the 'parallel' row axis can be sharded across both TensorCores on v7x."""
    mp8 = _round_up(max(m, 1), 8)
    if mp8 <= 8:
        return 8
    return min(cap, _round_up((mp8 + 1) // 2, 8))


# ----------------------------- Pallas kernels -------------------------------

def _linear_kernel(x_ref, w_ref, b_ref, o_ref):
    # atom embedding: plain Linear (no activation)
    o_ref[...] = (jnp.dot(x_ref[...], w_ref[...], preferred_element_type=jnp.float32)
                  + b_ref[...])


def _egnn_layer_kernel(d_ref, hj_ref, h_ref,
                       w1e_ref, w1i_ref, w1j_ref, b1_ref,
                       w2_ref, b2_ref, wi_ref, bi_ref,
                       expand_ref, off_ref,
                       nw1m_ref, nw1h_ref, nb1_ref, nw2_ref, nb2_ref,
                       o_ref, *, coeff):
    """One EnBaseLayer plus the encoder-level residual, fully fused.

    Edge-domain tensors are packed k-per-row along lanes: (tile_rows, k*H).
    Block-diagonal weights apply the per-edge Linear to each packed chunk and
    the scatter_sum over dst (k consecutive edges per node) is folded into the
    vertically stacked first node-MLP weight.
    """
    h = h_ref[...]                       # (tm, H)   == hi for all k edges of a node
    expand = expand_ref[...]             # (k, k*H)  row e -> ones on chunk e

    # GaussianSmearing fused: expand (tm, k) distances to (tm, k*H) and exp on EUP.
    # Padded gaussian lanes (>= num_gaussians) hit zero rows of w1e_blk -> no effect.
    d_exp = jnp.dot(d_ref[...], expand, preferred_element_type=jnp.float32)
    diff = d_exp - off_ref[...]
    ea = jnp.exp(coeff * diff * diff)

    # edge_mlp: Linear([ea, hi, hj]) -> ReLU -> Linear -> ReLU   (act_last=True)
    t = (jnp.dot(ea, w1e_ref[...], preferred_element_type=jnp.float32)
         + jnp.dot(h, w1i_ref[...], preferred_element_type=jnp.float32)
         + jnp.dot(hj_ref[...], w1j_ref[...], preferred_element_type=jnp.float32)
         + b1_ref[...])
    t = jnp.maximum(t, 0.0)
    m = jnp.dot(t, w2_ref[...], preferred_element_type=jnp.float32) + b2_ref[...]
    m = jnp.maximum(m, 0.0)

    # edge_inf: one sigmoid gate per packed edge (EUP exp + approx reciprocal).
    logit = jnp.dot(m, wi_ref[...], preferred_element_type=jnp.float32) + bi_ref[...]
    gate = pl.reciprocal(1.0 + jnp.exp(-logit), approx=True)          # (tm, k)
    msg = m * jnp.dot(gate, expand, preferred_element_type=jnp.float32)

    # node_mlp([mi, h]) + residual; the k-sum (scatter_sum over dst) is folded
    # into nw1m_stacked = vstack([nw1m] * k).
    t2 = (jnp.dot(msg, nw1m_ref[...], preferred_element_type=jnp.float32)
          + jnp.dot(h, nw1h_ref[...], preferred_element_type=jnp.float32)
          + nb1_ref[...])
    t2 = jnp.maximum(t2, 0.0)
    o_ref[...] = (h + jnp.dot(t2, nw2_ref[...], preferred_element_type=jnp.float32)
                  + nb2_ref[...])


# ------------------------------ pallas wrappers ------------------------------

def _row_call(kernel, row_inputs, full_inputs, out_dim, tm):
    """pallas_call tiled over rows; row counts must already be multiples of tm."""
    mp = row_inputs[0].shape[0]
    in_specs = [pl.BlockSpec((tm, x.shape[1]), lambda i: (i, 0)) for x in row_inputs]
    in_specs += [pl.BlockSpec(tuple(f.shape), lambda i: (0, 0)) for f in full_inputs]
    return pl.pallas_call(
        kernel,
        out_shape=jax.ShapeDtypeStruct((mp, out_dim), jnp.float32),
        grid_spec=pltpu.PrefetchScalarGridSpec(
            num_scalar_prefetch=0,
            grid=(mp // tm,),
            in_specs=in_specs,
            out_specs=pl.BlockSpec((tm, out_dim), lambda i: (i, 0)),
        ),
        compiler_params=pltpu.CompilerParams(
            dimension_semantics=("parallel",),
            vmem_limit_bytes=32 * 1024 * 1024),   # safe on v5e/v6e/v7x
    )(*row_inputs, *full_inputs)


def _linear_pallas(x, w, b):
    m = x.shape[0]
    tm = _choose_row_tile(m)
    mp = _round_up(m, tm)
    xp = x if mp == m else jnp.pad(x, ((0, mp - m), (0, 0)))
    out = _row_call(_linear_kernel, [xp], [w, b.reshape(1, -1)], w.shape[1], tm)
    return out[:m]


def _egnn_layer_pallas(d_pad, hj_pad, h_pad, prep, coeff, tm):
    full = [prep["w1e_blk"], prep["w1i_t"], prep["w1j_blk"], prep["b1_t"],
            prep["w2_blk"], prep["b2_t"], prep["wi_blk"], prep["bi_t"],
            prep["expand"], prep["off_t"],
            prep["nw1m_s"], prep["nw1h"], prep["nb1"], prep["nw2"], prep["nb2"]]
    return _row_call(functools.partial(_egnn_layer_kernel, coeff=coeff),
                     [d_pad, hj_pad, h_pad], full, h_pad.shape[1], tm)


# ------------------------------ graph plumbing -------------------------------

def knn_edges(pos, batch, k):
    # TODO(synk): knn_graph (per-node top-k over a batch-masked pairwise distance
    # matrix) is data-dependent graph construction; kept in XLA, not Pallas.
    n = pos.shape[0]
    diff = pos[:, None, :] - pos[None, :, :]
    d2 = jnp.sum(diff * diff, axis=-1)
    same_graph = batch[:, None] == batch[None, :]
    self_loop = jnp.eye(n, dtype=bool)
    masked = jnp.where(same_graph & (~self_loop), d2, jnp.inf)
    _, nbr = jax.lax.top_k(-masked, k)       # k nearest sources per target node
    dst = jnp.repeat(jnp.arange(n), k)       # targets (flow='target_to_source')
    src = nbr.reshape(-1)                    # sources
    return dst, src


def compose_context_prop(h_protein, h_ligand, pos_protein, pos_ligand,
                         batch_protein, batch_ligand):
    batch_ctx = jnp.concatenate([batch_protein, batch_ligand], axis=0)
    sort_idx = jnp.argsort(batch_ctx)        # stable sort
    h_ctx = jnp.concatenate([h_protein, h_ligand], axis=0)[sort_idx]
    pos_ctx = jnp.concatenate([pos_protein, pos_ligand], axis=0)[sort_idx]
    return h_ctx, pos_ctx, batch_ctx[sort_idx]


# ------------------------------ forward passes --------------------------------

def encoder_forward_pallas(prepped_layers, h, pos, batch, *, k, coeff):
    """EnEquiEncoder.forward (update_x=False) with one fused kernel per layer."""
    n, hidden = h.shape
    dst, src = knn_edges(pos, batch, k)
    dvec = pos[dst] - pos[src]
    d = jnp.sqrt(jnp.sum(dvec * dvec, axis=-1)).reshape(n, k)

    # Pad the node domain ONCE (no per-stage pad / slice inside the layer loop).
    tm = _choose_row_tile(n)
    np_ = _round_up(n, tm)
    if np_ != n:
        h = jnp.pad(h, ((0, np_ - n), (0, 0)))
        d = jnp.pad(d, ((0, np_ - n), (0, 0)))
        src = jnp.pad(src, (0, (np_ - n) * k))   # dummy neighbors for padded rows

    for prep in prepped_layers:
        # TODO(synk): the h[src] neighbor gather stays in XLA; an in-kernel gather
        # would need scalar-prefetched indices plus per-row DMA.
        hj = jnp.take(h, src, axis=0).reshape(np_, k * hidden)
        h = _egnn_layer_pallas(d, hj, h, prep, coeff, tm)
    return h[:n]


def _out_block_jnp(x, w1, b1, w2, b2):
    # Left to XLA per perf review: (num_graphs, 32) -> (num_graphs, 1) is far
    # below the Pallas per-call fixed cost and would be a 1-lane masked store.
    t = jnp.dot(x, w1) + b1
    t = jnp.logaddexp(t, 0.0) - _LOG2           # ShiftedSoftplus
    return jnp.dot(t, w2) + b2


def prop_pred_forward_pallas(params, prepped_layers, inputs, *, k):
    """PropPredNetEnc.forward with enc_*_dim == 0, enc features None, output_kind None."""
    h_protein = _linear_pallas(inputs["protein_atom_feature"],
                               params["p_emb_w"], params["p_emb_b"])
    h_ligand = _linear_pallas(inputs["ligand_atom_feature"],
                              params["l_emb_w"], params["l_emb_b"])
    h_ctx, pos_ctx, batch_ctx = compose_context_prop(
        h_protein, h_ligand, inputs["protein_pos"], inputs["ligand_pos"],
        inputs["batch_protein"], inputs["batch_ligand"])
    h_ctx = encoder_forward_pallas(prepped_layers, h_ctx, pos_ctx, batch_ctx,
                                   k=k, coeff=params["coeff"])
    # TODO(synk): enc_node_layer / enc_graph_feature concat / output_kind one-hot
    # masking are inactive in this configuration (dims 0 / None) and not implemented.
    pre_out = jax.ops.segment_sum(h_ctx, batch_ctx, num_segments=inputs["num_graphs"])
    return _out_block_jnp(pre_out, params["out_w1"], params["out_b1"],
                          params["out_w2"], params["out_b2"])


def prop_pred_forward_reference(params, inputs, *, k):
    """Pure-JAX (unfused, HIGHEST precision) reference of the same forward."""
    hp = jax.lax.Precision.HIGHEST

    def dot(a, b):
        return jnp.dot(a, b, precision=hp)

    h_protein = dot(inputs["protein_atom_feature"], params["p_emb_w"]) + params["p_emb_b"]
    h_ligand = dot(inputs["ligand_atom_feature"], params["l_emb_w"]) + params["l_emb_b"]
    h, pos, batch = compose_context_prop(
        h_protein, h_ligand, inputs["protein_pos"], inputs["ligand_pos"],
        inputs["batch_protein"], inputs["batch_ligand"])
    n = h.shape[0]
    dst, src = knn_edges(pos, batch, k)
    dvec = pos[dst] - pos[src]
    edge_len = jnp.sqrt(jnp.sum(dvec * dvec, axis=-1))
    diff = edge_len.reshape(-1, 1) - params["offset"].reshape(1, -1)
    edge_attr = jnp.exp(params["coeff"] * diff * diff)
    for p in params["enc_layers"]:
        hi = jnp.take(h, dst, axis=0)
        hj = jnp.take(h, src, axis=0)
        t = jnp.maximum(dot(edge_attr, p["w1e"]) + dot(hi, p["w1i"])
                        + dot(hj, p["w1j"]) + p["b1"], 0.0)
        m = jnp.maximum(dot(t, p["w2"]) + p["b2"], 0.0)
        gate = 1.0 / (1.0 + jnp.exp(-(dot(m, p["wi"]) + p["bi"])))
        mi = jax.ops.segment_sum(m * gate, dst, num_segments=n)
        t2 = jnp.maximum(dot(mi, p["nw1m"]) + dot(h, p["nw1h"]) + p["nb1"], 0.0)
        h = h + dot(t2, p["nw2"]) + p["nb2"]
    pre_out = jax.ops.segment_sum(h, batch, num_segments=inputs["num_graphs"])
    t = dot(pre_out, params["out_w1"]) + params["out_b1"]
    t = jnp.logaddexp(t, 0.0) - _LOG2
    return dot(t, params["out_w2"]) + params["out_b2"]


# ------------------------------ parameters -----------------------------------

def make_params(key, *, protein_dim, ligand_dim, hidden, num_gaussians,
                num_layers, out_dim, cutoff):
    def lin_init(kk, fan_in, fan_out):
        kw, kb = jax.random.split(kk)
        w = jax.random.normal(kw, (fan_in, fan_out), jnp.float32) / jnp.sqrt(
            jnp.float32(fan_in))
        b = 0.01 * jax.random.normal(kb, (fan_out,), jnp.float32)
        return w, b

    keys = iter(jax.random.split(key, 8 + 8 * num_layers))
    params = {}
    params["p_emb_w"], params["p_emb_b"] = lin_init(next(keys), protein_dim, hidden)
    params["l_emb_w"], params["l_emb_b"] = lin_init(next(keys), ligand_dim, hidden)

    layers = []
    for _ in range(num_layers):
        w1, b1 = lin_init(next(keys), num_gaussians + 2 * hidden, hidden)
        w2, b2 = lin_init(next(keys), hidden, hidden)
        wi, bi = lin_init(next(keys), hidden, 1)
        nw1, nb1 = lin_init(next(keys), 2 * hidden, hidden)
        nw2, nb2 = lin_init(next(keys), hidden, hidden)
        layers.append(dict(
            w1e=w1[:num_gaussians],                       # rows for edge_attr
            w1i=w1[num_gaussians:num_gaussians + hidden], # rows for hi
            w1j=w1[num_gaussians + hidden:], b1=b1,       # rows for hj
            w2=w2, b2=b2, wi=wi, bi=bi,
            nw1m=nw1[:hidden], nw1h=nw1[hidden:], nb1=nb1, nw2=nw2, nb2=nb2))
    params["enc_layers"] = layers

    params["out_w1"], params["out_b1"] = lin_init(next(keys), hidden, hidden)
    params["out_w2"], params["out_b2"] = lin_init(next(keys), hidden, out_dim)

    # GaussianSmearing(start=0, stop=cutoff, num_gaussians, fixed_offset=False)
    offset = jnp.linspace(0.0, cutoff, num_gaussians).astype(jnp.float32)
    step = float(offset[1] - offset[0])
    params["offset"] = offset
    params["coeff"] = -0.5 / (step * step)
    return params


def prep_pallas_layers(params, *, k, hidden, num_gaussians):
    """Precompute the block-diagonal / tiled weights for the fused layer kernel."""
    assert num_gaussians <= hidden, "gaussian chunk is padded up to the hidden width"

    def blockdiag(w, reps):
        return jnp.kron(jnp.eye(reps, dtype=w.dtype), w)

    off_pad = jnp.pad(params["offset"], (0, hidden - num_gaussians))
    prepped = []
    for p in params["enc_layers"]:
        w1e_pad = jnp.pad(p["w1e"], ((0, hidden - num_gaussians), (0, 0)))
        prepped.append(dict(
            w1e_blk=blockdiag(w1e_pad, k),                        # (k*H, k*H)
            w1i_t=jnp.tile(p["w1i"], (1, k)),                     # (H,   k*H)
            w1j_blk=blockdiag(p["w1j"], k),                       # (k*H, k*H)
            b1_t=jnp.tile(p["b1"].reshape(1, -1), (1, k)),        # (1,   k*H)
            w2_blk=blockdiag(p["w2"], k),                         # (k*H, k*H)
            b2_t=jnp.tile(p["b2"].reshape(1, -1), (1, k)),        # (1,   k*H)
            wi_blk=blockdiag(p["wi"], k),                         # (k*H, k)
            bi_t=jnp.tile(p["bi"].reshape(1, 1), (1, k)),         # (1,   k)
            expand=blockdiag(jnp.ones((1, hidden), jnp.float32), k),  # (k, k*H)
            off_t=jnp.tile(off_pad.reshape(1, -1), (1, k)),       # (1,   k*H)
            nw1m_s=jnp.tile(p["nw1m"], (k, 1)),                   # (k*H, H) folds k-sum
            nw1h=p["nw1h"], nb1=p["nb1"].reshape(1, -1),
            nw2=p["nw2"], nb2=p["nb2"].reshape(1, -1)))
    return prepped


# ----------------------------------- main -------------------------------------

if __name__ == "__main__":
    HIDDEN = 32          # config.hidden_channels / encoder hidden_dim
    NUM_GAUSS = 20       # config.encoder.num_r_gaussian
    NUM_LAYERS = 2       # config.encoder.num_layers
    KNN = 8              # config.encoder.knn
    CUTOFF = 10.0        # config.encoder.cutoff
    OUT_DIM = 1
    PROTEIN_DIM = 27
    LIGAND_DIM = 13
    N_GRAPHS = 2
    PROT_PER_GRAPH = 10
    LIG_PER_GRAPH = 6

    key = jax.random.PRNGKey(0)
    k_inp, k_par = jax.random.split(key)
    ks = jax.random.split(k_inp, 4)
    protein_pos = 2.0 * jax.random.normal(
        ks[0], (N_GRAPHS * PROT_PER_GRAPH, 3), jnp.float32)
    ligand_pos = 2.0 * jax.random.normal(
        ks[1], (N_GRAPHS * LIG_PER_GRAPH, 3), jnp.float32)
    protein_feat = jax.random.normal(
        ks[2], (N_GRAPHS * PROT_PER_GRAPH, PROTEIN_DIM), jnp.float32)
    ligand_feat = jax.random.normal(
        ks[3], (N_GRAPHS * LIG_PER_GRAPH, LIGAND_DIM), jnp.float32)
    batch_protein = jnp.repeat(jnp.arange(N_GRAPHS), PROT_PER_GRAPH)
    batch_ligand = jnp.repeat(jnp.arange(N_GRAPHS), LIG_PER_GRAPH)

    params = make_params(k_par, protein_dim=PROTEIN_DIM, ligand_dim=LIGAND_DIM,
                         hidden=HIDDEN, num_gaussians=NUM_GAUSS,
                         num_layers=NUM_LAYERS, out_dim=OUT_DIM, cutoff=CUTOFF)
    prepped_layers = prep_pallas_layers(params, k=KNN, hidden=HIDDEN,
                                        num_gaussians=NUM_GAUSS)

    inputs = dict(protein_pos=protein_pos, protein_atom_feature=protein_feat,
                  ligand_pos=ligand_pos, ligand_atom_feature=ligand_feat,
                  batch_protein=batch_protein, batch_ligand=batch_ligand,
                  num_graphs=N_GRAPHS)

    out = prop_pred_forward_pallas(params, prepped_layers, inputs, k=KNN)
    out = jax.block_until_ready(out)

    ref = prop_pred_forward_reference(params, inputs, k=KNN)
    ref = jax.block_until_ready(ref)

    assert out.shape == (N_GRAPHS, OUT_DIM)
    assert bool(jnp.all(jnp.isfinite(out)))
    max_err = float(jnp.max(jnp.abs(out - ref)))
    scale = float(jnp.max(jnp.abs(ref))) + 1.0
    assert max_err <= 5e-2 * scale, f"mismatch vs reference: max abs err = {max_err}"
    print("KERNEL_OK")
</pallas_src>

<mosaic_0001>
module attributes {stable_mosaic.version = 11 : i64} {
  func.func @_linear_kernel(%arg0: i32, %arg1: memref<16x27xf32, #tpu.memory_space<vmem>>, %arg2: memref<27x32xf32, #tpu.memory_space<vmem>>, %arg3: memref<1x32xf32, #tpu.memory_space<vmem>>, %arg4: memref<16x32xf32, #tpu.memory_space<vmem>>) attributes {dimension_semantics = [#tpu.dimension_semantics<parallel>], iteration_bounds = array<i64: 2>, scalar_prefetch = 0 : i64, scratch_operands = 0 : i64, tpu.core_type = #tpu.core_type<tc>, window_params = [{transform_indices = @transform_0, window_bounds = array<i64: 16, 27>}, {pipeline_mode = #tpu.pipeline_mode<synchronous>, transform_indices = @transform_1, window_bounds = array<i64: 27, 32>}, {pipeline_mode = #tpu.pipeline_mode<synchronous>, transform_indices = @transform_2, window_bounds = array<i64: 1, 32>}, {transform_indices = @transform_3, window_bounds = array<i64: 16, 32>}]} {
    %c0 = arith.constant 0 : index
    %c0_0 = arith.constant 0 : index
    %0 = vector.load %arg1[%c0, %c0_0] : memref<16x27xf32, #tpu.memory_space<vmem>>, vector<16x27xf32>
    %c0_1 = arith.constant 0 : index
    %c0_2 = arith.constant 0 : index
    %1 = vector.load %arg2[%c0_1, %c0_2] : memref<27x32xf32, #tpu.memory_space<vmem>>, vector<27x32xf32>
    %cst = arith.constant dense<0.000000e+00> : vector<16x32xf32>
    %2 = tpu.matmul %0, %1, %cst {dimension_numbers = #tpu.dot_dimension_numbers<[1], [0], [0], [1], [0, 0, 1, 1], [], []>} : vector<16x27xf32>, vector<27x32xf32>, vector<16x32xf32> -> vector<16x32xf32>
    %c0_3 = arith.constant 0 : index
    %c0_4 = arith.constant 0 : index
    %3 = vector.load %arg3[%c0_3, %c0_4] : memref<1x32xf32, #tpu.memory_space<vmem>>, vector<1x32xf32>
    %4 = vector.broadcast %3 : vector<1x32xf32> to vector<16x32xf32>
    %5 = arith.addf %2, %4 : vector<16x32xf32>
    %c0_5 = arith.constant 0 : index
    %c0_6 = arith.constant 0 : index
    %6 = vector.load %arg4[%c0_5, %c0_6] : memref<16x32xf32, #tpu.memory_space<vmem>>, vector<16x32xf32>
    tpu.vector_store %arg4[%c0_5, %c0_6], %5 {strides = array<i32>} : memref<16x32xf32, #tpu.memory_space<vmem>>, vector<16x32xf32>,
    return
  }
  func.func @transform_0(%arg0: i32) -> (i32, i32) {
    %c0_i32 = arith.constant 0 : i32
    %c0_i32_0 = arith.constant 0 : i32
    return %arg0, %c0_i32 : i32, i32
  }
  func.func @transform_1(%arg0: i32) -> (i32, i32) {
    %c0_i32 = arith.constant 0 : i32
    %c0_i32_0 = arith.constant 0 : i32
    %c0_i32_1 = arith.constant 0 : i32
    return %c0_i32, %c0_i32_0 : i32, i32
  }
  func.func @transform_2(%arg0: i32) -> (i32, i32) {
    %c0_i32 = arith.constant 0 : i32
    %c0_i32_0 = arith.constant 0 : i32
    %c0_i32_1 = arith.constant 0 : i32
    return %c0_i32, %c0_i32_0 : i32, i32
  }
  func.func @transform_3(%arg0: i32) -> (i32, i32) {
    %c0_i32 = arith.constant 0 : i32
    %c0_i32_0 = arith.constant 0 : i32
    return %arg0, %c0_i32 : i32, i32
  }
}

</mosaic_0001>

<bundles_post_ra>
// kernel: tpu_custom_call.1
= control target key start
LH: loop header
LB: loop body
LE: loop exit
PB: predicated region body
PF: predicated region fallthrough
CT: control target
= control target key end

     0   :  { %8 = vsyncpa [#allocation3], 0  ;;  %s886_s0 = inlined_call_operand.hbm [shape: f32[32,27], index: 0, kind: input, shape index: {}]   ;;  %s887_s1 = inlined_call_operand.hbm [shape: f32[27,32], index: 1, kind: input, shape index: {}]   ;;  %s888_s2 = inlined_call_operand.vmem [shape: f32[1,32], index: 2, kind: input, shape index: {}]   ;;  %s889_s3 = inlined_call_operand.hbm [shape: f32[32,32], index: 3, kind: output, shape index: {}]  }
   0x1   :  { %10 = vsyncpa [#allocation3 + $0x1], 0 }
   0x2   :  { %11 = vsyncpa [#allocation6], 0 }
   0x3   :  { %12 = vsyncpa [#allocation4], 0 }
   0x4   :  { %14 = vsyncpa [#allocation4 + $0x1], 0  ;;  %s674_s12 = smov 0   ;;  %s676_s13 = smov 0  }
   0x5   :  { %s678_s14 = smov 0   ;;  %s680_s15 = smov 0  }
   0x6 LB: > { %s695_s16 = sadd.s32 4294967295, %s644_s15   ;;  %s405_s17 = sadd.s32 4294967294, %s644_s15   ;;  %s644_s15 = sphi %s680_s15, %s909_s15   ;;  %s640_s14 = sphi %s678_s14, %s908_s14   ;;  %s636_s13 = sphi %s676_s13, %s907_s13   ;;  %s632_s12 = sphi %s674_s12, %s906_s12  }
   0x7   : > { %p40_p0 = scmp.ne.s32.totalorder %s636_s13, %s632_s12  ;;  %p890_p1 = scmp.eq.s32.totalorder %s695_s16, 0 }
   0x8   : > { %p112_p3 = scmp.eq.s32.totalorder %s405_s17, 1  ;;  %p406_p5 = scmp.ge.s32.totalorder %s644_s15, 1 }
   0x9   : > { %p704_p4 = por %p890_p1, %p40_p0  ;;  %p119_p7 = scmp.lt.s32.totalorder %s644_s15, 3 }
   0xa   : > { %p709_p6 = por %p112_p3, %p40_p0  ;;  %s646_s21 = smov [#allocation5]  }
   0xb   : > { %s893_s18 = scalar_select %p704_p4, 1, 0 }
   0xc   : > { %s894_s19 = scalar_select %p709_p6, 1, 0 }
   0xd   : > { %p714_p8 = pnand %p406_p5, %p119_p7  ;;  %s131_s22 = sshll.u32 %s646_s21, 4  ;;  %s718_s22 = int_to_ptr.vmem [resolvable:$true] %s131_s22 }
   0xe   : > { %s730_s24 = sadd.s32 1, %s644_s15   ;;  %s27_s25 = sadd.s32 1, %s640_s14 }
   0xf   : > { %s895_s20 = scalar_select %p714_p8, 1, 0 }
  0x10   : > { %p462_p9 = pneg %p714_p8  ;;  %s24_s26 = ssub.s32 %s644_s15, %s730_s24 }
  0x11   : > { %s516_s29 = scalar_lea.hbm %s887_s1, 512 }
  0x12   : > { %p725_p11 = pnand %p462_p9, %p890_p1  ;;  %p517_p12 = scmp.ne.s32.totalorder %s887_s1, %s516_s29 }
  0x13   : > { %p523_p5 = scmp.lt.u32.totalorder %s516_s29, %s887_s1 }
  0x14   : > { %p518_p13 = pneg %p725_p11 }
  0x16   : > { %p519_p0 = pnand %p518_p13, %p517_p12 }
  0x18   : > { %p520_p3 = pneg %p519_p0 }
  0x1a   : > { %p525_p7 = pnand %p523_p5, %p520_p3 }
  0x1c   : > { %528 = shalt.err (!%p525_p7)
}
  0x1d   : > { %s529_s7 = scalar_lea.vmem %s718_s22, 512  ;;  %p537_p2 = scmp.lt.s32.totalorder %s718_s22, %s718_s22 }
  0x1e   : > { %p530_p9 = scmp.ne.s32.totalorder %s718_s22, %s529_s7  ;;  %p538_p6 = scmp.lt.s32.totalorder %s529_s7, %s529_s7 }
  0x20   : > { %p532_p10 = pnand %p530_p9, %p518_p13  ;;  %p539_p4 = por %p538_p6, %p537_p2 }
  0x22   : > { %p533_p1 = pneg %p532_p10 }
  0x24   : > { %p540_p8 = pnand %p539_p4, %p533_p1 }
  0x26   : > { %543 = shalt.err (!%p540_p8)
}
  0x27   : > { %s647_s8 = smov 128   ;;  %s648_s9 = smov 8  }
  0x28   : > { %465 = dma.hbm_to_vmem [thread:$0]  (!%p725_p11), %s887_s1, 512, %s718_s22, [#allocation6], %s647_s8, %s647_s8, %s648_s9  }
  0x29   : > { %p25_p1 = scmp.eq.s32.totalorder %s24_s26, 0  ;;  %p34_p2 = scmp.ne.s32.totalorder %s640_s14, %s636_s13 }
  0x2a   : > { %p35_p4 = scmp.eq.s32.totalorder %s644_s15, 0  ;;  %p475_p6 = scmp.lt.s32.totalorder %s644_s15, 2 }
  0x2b   : > { %s764_s17 = scalar_select %p25_p1, %s640_s14, %s27_s25  }
  0x2c   : > { %p36_p8 = por %p35_p4, %p34_p2  ;;  %p897_p10 = scmp.eq.s32.totalorder %s695_s16, 1 }
  0x2d   : > { %s148_s23 = sand.u32 1, %s640_s14   ;;  %s425_s27 = sshll.u32 %s644_s15, 8 }
  0x2e   : > { %p768_p12 = por %p897_p10, %p34_p2  ;;  %s409_s28 = sshll.u32 %s148_s23, 4 }
  0x2f   : > { %s777_s4 = scalar_lea.hbm %s886_s0, %s425_s27  ;;  %s152_s22 = scalar_lea.vmem [#allocation2], %s409_s28 }
  0x30   : > { %s159_s25 = sshll.u32 %s152_s22, 4  ;;  %p779_p11 = pnand %p475_p6, %p36_p8  ;;  %s783_s25 = int_to_ptr.vmem [resolvable:$true] %s159_s25 }
  0x31   : > { %s785_s5 = scalar_lea.sflag [#allocation3], %s148_s23  ;;  %s544_s6 = scalar_lea.hbm %s777_s4, 256 }
  0x32   : > { %p545_p13 = scmp.ne.s32.totalorder %s777_s4, %s544_s6  ;;  %p546_p0 = pneg %p779_p11 }
  0x33   : > { %s549_s11 = scalar_lea.hbm %s886_s0, 512  ;;  %p550_p7 = scmp.lt.u32.totalorder %s777_s4, %s886_s0 }
  0x34   : > { %p547_p3 = pnand %p546_p0, %p545_p13  ;;  %p551_p9 = scmp.lt.u32.totalorder %s549_s11, %s544_s6 }
  0x35   : > { %p553_p2 = scmp.lt.u32.totalorder %s544_s6, %s777_s4 }
  0x36   : > { %p548_p5 = pneg %p547_p3  ;;  %p552_p1 = por %p551_p9, %p550_p7 }
  0x38   : > { %p554_p4 = por %p553_p2, %p552_p1 }
  0x3a   : > { %p555_p6 = pnand %p554_p4, %p548_p5 }
  0x3c   : > { %558 = shalt.err (!%p555_p6)
}
  0x3d   : > { %s559_s23 = scalar_lea.vmem %s783_s25, 256  ;;  %s649_s29 = smov [#allocation2]  }
  0x3e   : > { %p560_p8 = scmp.ne.s32.totalorder %s783_s25, %s559_s23  ;;  %s564_s30 = sshll.u32 %s649_s29, 4  ;;  %s565_s30 = int_to_ptr.vmem [resolvable:$false] %s564_s30 }
  0x3f   : > { %s566_s22 = scalar_lea.vmem %s565_s30, 512  ;;  %p567_p3 = scmp.lt.s32.totalorder %s783_s25, %s565_s30 }
  0x40   : > { %p562_p10 = pnand %p560_p8, %p546_p0  ;;  %p568_p7 = scmp.lt.s32.totalorder %s566_s22, %s559_s23 }
  0x42   : > { %p563_p13 = pneg %p562_p10  ;;  %p569_p9 = por %p568_p7, %p567_p3 }
  0x44   : > { %p570_p1 = pnand %p569_p9, %p563_p13 }
  0x46   : > { %573 = shalt.err (!%p570_p1)
}
  0x47   : > { %469 = dma.hbm_to_vmem [thread:$0]  (!%p779_p11), %s777_s4, 256, %s783_s25, %s785_s5, %s647_s8, %s647_s8, %s648_s9  }
  0x48   : > { %p900_p0 = scmp.ne.s32.totalorder %s895_s20, 0 }
  0x49   : > { %s819_s6 = sand.u32 (!%p900_p0), 1, %s636_s13   ;;  %p901_p5 = scmp.ne.s32.totalorder (!%p900_p0), %s893_s18, 0 }
  0x4a   : > { %171 = sbr.rel (%p900_p0) target bundleno = 326 (0x146), region = 32  ;;  %s413_s7 = sshll.u32 (!%p900_p0), %s819_s6, 4 }
  0x4b   : > { %s174_s10 = scalar_lea.sflag (!%p900_p0), [#allocation3], %s819_s6  ;;  %s177_s11 = scalar_lea.vmem (!%p900_p0), [#allocation2], %s413_s7 }
  0x51   : > { %619 = dma.done.wait (%p901_p5), %s174_s10, 256  }
  0x52   : > { %621 = vsyncadd (%p901_p5), %s174_s10, 4294967040  ;;  %p902_p2 = scmp.eq.s32.totalorder %s695_s16, 0 }
  0x54   : > { %623 = dma.done.wait (%p902_p2), [#allocation6], 512   ;;  %p903_p11 = pmov %p902_p2 }
  0x55   : > { %vm226_vm0 = vcmask 1042432   ;;  %vm219_vm1 = vcmask 220160   ;;  %v208_v0 = vld [vmem:[#allocation5] sm:$0xff]  ;;  %v209_v1 = vld [vmem:[#allocation5 + $0x8] sm:$0xff]  ;;  %v210_v2 = vld [vmem:[#allocation5 + $0x10] sm:$0xff]  ;;  %vm650_vm2 = vmmov 1  }
  0x56   : > { %625 = vsyncadd (%p903_p11), [#allocation6], 4294966784  ;;  %v444_v3 = vpack.c.bf16 %v209_v1, %v208_v0  ;;  %v211_v4 = vld [vmem:[#allocation5 + $0x18] sm:$0x7]  ;;  %v206_v5 = vld [vmem:[%s177_s11] sm:$0xff]  ;;  %s203_s18 = scalar_lea.vmem [#allocation7], %s413_s7 }
  0x57   : > { %v448_v6 = vpack.c.bf16 %v211_v4, %v210_v2  ;;  %vm449_vm3 = vmpackc.low %vm226_vm0, %vm650_vm2  ;;  %441 = vmatprep.mubr.msk.f32.mxu0 %vm219_vm1, %v206_v5  ;;  %v207_v7 = vld [vmem:[%s177_s11 + $0x8] sm:$0xff]  ;;  %s322_s20 = sshll.u32 %s203_s18, 4  ;;  %v416_v8 = vld [vmem:[%s888_s2] ss:$0 sm:$0xff]  ;;  %s426_s4 = sshll.u32 %s695_s16, 8  ;;  %vm305_vm4 = vcmask 261120   ;;  %s837_s20 = int_to_ptr.vmem [resolvable:$true] %s322_s20 }
  0x58   : > { %445 = vmatprep.subr.bf16.mxu0 %v444_v3  ;;  %s842_s5 = scalar_lea.hbm %s889_s3, %s426_s4  ;;  %s309_s27 = scalar_lea.sflag [#allocation4], %s819_s6 }
  0x59   : > { %447 = vmatpush3.bf16.msra.mxu0 %v444_v3  ;;  %s574_s28 = scalar_lea.vmem %s837_s20, 256  ;;  %s651_s16 = smov [#allocation7]  }
  0x5a   : > { %450 = vmatprep.subr.msk.bf16.mxu0 %vm449_vm3, %v448_v6  ;;  %p575_p4 = scmp.ne.s32.totalorder %s837_s20, %s574_s28  ;;  %s578_s23 = sshll.u32 %s651_s16, 4  ;;  %s579_s23 = int_to_ptr.vmem [resolvable:$false] %s578_s23 }
  0x5b   : > { %s580_s29 = scalar_lea.vmem %s579_s23, 512  ;;  %p581_p10 = scmp.lt.s32.totalorder %s837_s20, %s579_s23 }
  0x5c   : > { %p576_p6 = pnand %p575_p4, %p768_p12  ;;  %p582_p13 = scmp.lt.s32.totalorder %s580_s29, %s574_s28 }
  0x5d   : > { %453 = vmatpush3.bf16.msk.msra.mxu0 %vm449_vm3, %v448_v6 }
  0x5e   : > { %p577_p8 = pneg %p576_p6  ;;  %p583_p3 = por %p582_p13, %p581_p10 }
  0x60   : > { %442 = vmatmul.mubr.msk.f32.vlgmr.msra.gmra.mrb[0].mxu0 %vm219_vm1, %v207_v7  ;;  %p584_p7 = pnand %p583_p3, %p577_p8 }
 0x133   : > { %v443_v9 = vpop.f32.mrb[0].mxu0 }
 0x134   : > { %v302_v10 = vadd.f32 %v443_v9, %v416_v8  ;;  %v296_v11 = vpop.f32.mrb[1].mxu0 }
 0x135   : > { %v297_v12 = vadd.f32 %v416_v8, %v296_v11 }
 0x136   : > { %307 = vst.msk [vmem:[%s203_s18 + $0x8] sm:$0xff] %vm305_vm4, %v302_v10 }
 0x137   : > { %306 = vst.msk [vmem:[%s203_s18] sm:$0xff] %vm305_vm4, %v297_v12 }
 0x138   : > { %587 = shalt.err (!%p584_p7)
}
 0x139   : > { %s588_s30 = scalar_lea.hbm %s842_s5, 256  ;;  %s592_s10 = scalar_lea.hbm %s889_s3, 512 }
 0x13a   : > { %p589_p9 = scmp.ne.s32.totalorder %s842_s5, %s588_s30  ;;  %p593_p5 = scmp.lt.u32.totalorder %s842_s5, %s889_s3 }
 0x13b   : > { %p594_p2 = scmp.lt.u32.totalorder %s592_s10, %s588_s30  ;;  %p596_p4 = scmp.lt.u32.totalorder %s588_s30, %s842_s5 }
 0x13c   : > { %p590_p1 = pnand %p589_p9, %p768_p12 }
 0x13d   : > { %p595_p11 = por %p594_p2, %p593_p5 }
 0x13e   : > { %p591_p0 = pneg %p590_p1 }
 0x13f   : > { %p597_p6 = por %p596_p4, %p595_p11 }
 0x141   : > { %p598_p8 = pnand %p597_p6, %p591_p0 }
 0x143   : > { %601 = shalt.err (!%p598_p8)
}
 0x144   : > { %s652_s8 = smov 128   ;;  %s653_s9 = smov 8  }
 0x145   : > { %460 = dma.vmem_to_hbm [thread:$0]  (%p768_p12), %s837_s20, 256, %s842_s5, %s309_s27, %s652_s8, %s652_s8, %s653_s9  }
 0x146 PF: > { %s337_s4 = sand.u32 1, %s632_s12   ;;  %p904_p10 = scmp.ne.s32.totalorder %s894_s19, 0 }
 0x147   : > { %p905_p13 = scmp.ge.s32.totalorder %s644_s15, 2  ;;  %s338_s25 = scalar_lea.sflag [#allocation4], %s337_s4 }
 0x149   : > { %p471_p3 = pnand %p905_p13, %p904_p10 }
 0x14b   : > { %627 = dma.done.wait (!%p471_p3), %s338_s25, 256  }
 0x14c   : > { %629 = vsyncadd (!%p471_p3), %s338_s25, 4294967040  ;;  %p17_p7 = scmp.ge.s32.totalorder %s730_s24, 4   ;;  %s906_s12 = smov %s636_s13 }
 0x14d   : > { %s907_s13 = smov %s640_s14  ;;  %s908_s14 = smov %s764_s17 }
 0x14e   : > { %s909_s15 = smov %s730_s24  ;;  %19 = sbr.rel (!%p17_p7) target bundleno = 6 (0x6), region = 81 }
 0x155   :  { %343 = vsyncpa [#allocation3], 1 }
 0x156   :  { %345 = vsyncpa [#allocation3 + $0x1], 1 }
 0x157   :  { %346 = vsyncpa [#allocation6], 1 }
 0x158   :  { %347 = vsyncpa [#allocation4], 1 }
 0x159   :  { %349 = vsyncpa [#allocation4 + $0x1], 1 }

</bundles_post_ra>
